<compile_context>
chip_gen: v5e
topology: v5e:2x2
jax: 0.10.0
libtpu: 0.0.40
codegen_flags: <defaults>
</compile_context>

<pallas_src>
import functools

import jax
import jax.numpy as jnp
from jax.experimental import pallas as pl
from jax.experimental.pallas import tpu as pltpu


_LANE = 128


def _round_up(n, m):
    return ((n + m - 1) // m) * m


def _sublane(dtype):
    """Minimum sublane multiple for a dtype (f32: 8, bf16: 16, int8/fp8: 32)."""
    return max(8, 32 // jnp.dtype(dtype).itemsize)


def _vmem_capacity_bytes():
    """Physical VMEM per TensorCore; conservative fallback if the query fails."""
    try:
        cap = int(pltpu.get_tpu_info().vmem_capacity_bytes)
        if cap > 0:
            return cap
    except Exception:
        pass
    return 64 << 20  # v7x per-TC size = safe lower bound for every generation


def prepare_params(w1, b1, w2, b2, param_dtype=None):
    """One-time layout prep (call once at init, NOT per forward pass).

    PyTorch nn.Linear stores W as (out, in) and computes x @ W.T + b; we
    transpose once to (in, out) for lane-dense x @ W on the MXU and zero-pad
    the hidden / output feature dims up to multiples of 128 lanes.

    param_dtype: optionally store the weight matrices in a narrower dtype
    (e.g. jnp.bfloat16) for the bf16 MXU rate and halved weight DMA/VMEM; the
    kernel still accumulates in f32 and keeps the bias/activation epilogue in
    f32 (v5e's VPU/EUP have no bf16 support).
    """
    hidden, c_in = w1.shape
    c_out = w2.shape[0]
    hid_p = _round_up(hidden, _LANE)
    c_out_p = _round_up(c_out, _LANE)

    w_dtype = param_dtype if param_dtype is not None else w1.dtype
    w1_t = jnp.zeros((c_in, hid_p), w_dtype).at[:, :hidden].set(w1.T.astype(w_dtype))
    w2_t = jnp.zeros((hid_p, c_out_p), w_dtype).at[:hidden, :c_out].set(w2.T.astype(w_dtype))
    b1_p = jnp.zeros((1, hid_p), jnp.float32).at[0, :hidden].set(b1.astype(jnp.float32))
    b2_p = jnp.zeros((1, c_out_p), jnp.float32).at[0, :c_out].set(b2.astype(jnp.float32))
    return {"w1_t": w1_t, "b1": b1_p, "w2_t": w2_t, "b2": b2_p,
            "c_in": c_in, "hidden": hidden, "c_out": c_out}


def _fcn2_kernel(x_ref, w1_ref, b1_ref, w2_ref, b2_ref, o_ref, *,
                 activation, c_out):
    # layer1: x @ W1 on the MXU with f32 accumulation; bias + ReLU on the VPU.
    x = x_ref[...].astype(w1_ref.dtype)
    h = jnp.dot(x, w1_ref[...], preferred_element_type=jnp.float32)
    h = jnp.maximum(h + b1_ref[...], 0.0)            # b1 is (1, hid_p) f32 -> broadcast

    # layer2: h @ W2 + b2 (f32 accumulation).
    y = jnp.dot(h.astype(w2_ref.dtype), w2_ref[...],
                preferred_element_type=jnp.float32)
    y = y + b2_ref[...]                              # b2 is (1, c_out_p) f32 -> broadcast

    c_out_p = y.shape[-1]
    if activation is None:
        out = y
    elif activation == "relu":
        out = jnp.maximum(y, 0.0)
    elif activation == "tanh":
        out = jnp.tanh(y)
    elif activation == "sigmoid":
        out = jax.nn.sigmoid(y)
    elif activation == "softmax":
        # nn.Softmax() on a 2-D input resolves to dim=1 (last axis).  Padded
        # lanes must not contribute to the denominator -> mask to -inf.
        if c_out_p != c_out:
            lane = jax.lax.broadcasted_iota(jnp.int32, y.shape, 1)
            y = jnp.where(lane < c_out, y, -jnp.inf)
        out = jax.nn.softmax(y, axis=-1)
    else:
        raise ValueError(f"unknown activation {activation!r}")

    # Unpadded (tb, c_out) output block: for heavily padded c_out this writes
    # up to 8x fewer HBM bytes than a lane-padded store + external slice pass.
    o_ref[...] = out[:, :c_out].astype(o_ref.dtype)


def _pick_batch_tile(B, c_in, hid_p, c_out_p, x_itemsize, w_itemsize,
                     sublane, budget_bytes):
    """Largest batch tile whose working set fits the generation-aware budget."""
    # Resident weights/biases counted 2x: the default pipeline allocates two
    # buffers per input BlockSpec even when its index_map is constant.
    weights = 2 * (c_in * hid_p + hid_p * c_out_p + hid_p + c_out_p) * w_itemsize

    def footprint(t):
        return (weights
                + 2 * t * c_in * x_itemsize       # double-buffered x blocks
                + 2 * t * c_out_p * x_itemsize    # double-buffered out blocks (conservative)
                + t * (hid_p + c_out_p) * 4)      # f32 intermediates h / y

    tb = _round_up(B, sublane)
    while tb > sublane and footprint(tb) > budget_bytes:
        tb = _round_up(tb // 2, sublane)
    # Keep >= ~4 grid steps when B allows it: restores DMA/compute overlap and
    # gives both v7x TensorCores work under dimension_semantics=("parallel",).
    tb = min(tb, max(sublane, _round_up(pl.cdiv(B, 4), sublane)))
    return tb, footprint(tb)


def _apply_activation(y, activation):
    if activation is None:
        return y
    if activation == "relu":
        return jnp.maximum(y, 0.0)
    if activation == "tanh":
        return jnp.tanh(y)
    if activation == "sigmoid":
        return jax.nn.sigmoid(y)
    if activation == "softmax":
        return jax.nn.softmax(y, axis=-1)
    raise ValueError(activation)


def _xla_forward(x, params, activation):
    """Fused plain-XLA path for tiny problems where pallas_call overhead dominates."""
    h = jnp.maximum(x @ params["w1_t"] + params["b1"], 0.0)
    y = (h @ params["w2_t"] + params["b2"])[:, :params["c_out"]]
    return _apply_activation(y, activation).astype(x.dtype)


def fcn_2layer(x, params, activation=None, use_pallas=None):
    """x: [B, c_in]; params: dict from prepare_params()."""
    B, c_in = x.shape
    assert c_in == params["c_in"]
    w1_t, b1 = params["w1_t"], params["b1"]
    w2_t, b2 = params["w2_t"], params["b2"]
    hid_p, c_out_p = w1_t.shape[1], w2_t.shape[1]
    c_out = params["c_out"]

    # For tiny problems a single fused XLA dot chain beats the fixed
    # pallas_call / DMA-setup overhead on every TPU generation.
    flops = 2 * B * (c_in * hid_p + hid_p * c_out_p)
    if use_pallas is None:
        use_pallas = flops >= (1 << 22)
    if not use_pallas:
        return _xla_forward(x, params, activation)

    cap = _vmem_capacity_bytes()
    budget = int(0.375 * cap)       # ~24 MiB on v7x (64 MiB/TC), ~48 MiB on v5e/v6e (128 MiB)
    sub = _sublane(x.dtype)
    tb, need = _pick_batch_tile(B, c_in, hid_p, c_out_p,
                                x.dtype.itemsize, w1_t.dtype.itemsize, sub, budget)
    # TODO(synk): if the resident weights alone exceed the budget (very large
    # hidden/c_out), also tile the hidden/output feature dims, not just batch.
    grid = (pl.cdiv(B, tb),)
    # Leave headroom for Mosaic internal scratch / semaphores: cap the scoped
    # limit at ~78% of physical VMEM (~50 MiB on v7x, ~100 MiB on v5e/v6e).
    vmem_limit = int(min(max(int(1.25 * need), 32 << 20), int(0.78 * cap)))

    kernel = functools.partial(_fcn2_kernel, activation=activation, c_out=c_out)

    x_bytes = x.size * x.dtype.itemsize
    w_bytes = ((w1_t.size + w2_t.size) * w1_t.dtype.itemsize
               + (b1.size + b2.size) * b1.dtype.itemsize)
    out_bytes = B * c_out * x.dtype.itemsize
    cost = pl.CostEstimate(
        flops=flops,
        transcendentals=(B * c_out_p) if activation in ("tanh", "sigmoid", "softmax") else 0,
        bytes_accessed=x_bytes + w_bytes + out_bytes,
    )

    return pl.pallas_call(
        kernel,
        out_shape=jax.ShapeDtypeStruct((B, c_out), x.dtype),
        grid=grid,
        in_specs=[
            pl.BlockSpec((tb, c_in), lambda i: (i, 0)),         # batch-tiled x
            pl.BlockSpec((c_in, hid_p), lambda i: (0, 0)),      # resident W1
            pl.BlockSpec((1, hid_p), lambda i: (0, 0)),         # resident b1
            pl.BlockSpec((hid_p, c_out_p), lambda i: (0, 0)),   # resident W2
            pl.BlockSpec((1, c_out_p), lambda i: (0, 0)),       # resident b2
        ],
        out_specs=pl.BlockSpec((tb, c_out), lambda i: (i, 0)),  # unpadded output
        compiler_params=pltpu.CompilerParams(
            dimension_semantics=("parallel",),   # megacore sharding on v7x
            vmem_limit_bytes=vmem_limit),
        cost_estimate=cost,
    )(x, w1_t, b1, w2_t, b2)


def _reference(x, w1, b1, w2, b2, activation=None):
    h = jnp.maximum(x @ w1.T + b1, 0.0)
    y = h @ w2.T + b2
    return _apply_activation(y, activation)


if __name__ == "__main__":
    # Deterministic synthetic params/inputs (no checkpoint load).
    input_ch, hidden_ch, output_ch = 32, 64, 16
    B = 256

    key = jax.random.PRNGKey(0)
    kx, kw1, kb1, kw2, kb2 = jax.random.split(key, 5)

    x = jax.random.normal(kx, (B, input_ch), dtype=jnp.float32)
    # PyTorch nn.Linear default init: U(-1/sqrt(fan_in), 1/sqrt(fan_in))
    lim1 = 1.0 / jnp.sqrt(input_ch)
    lim2 = 1.0 / jnp.sqrt(hidden_ch)
    w1 = jax.random.uniform(kw1, (hidden_ch, input_ch), jnp.float32, -lim1, lim1)
    b1 = jax.random.uniform(kb1, (hidden_ch,), jnp.float32, -lim1, lim1)
    w2 = jax.random.uniform(kw2, (output_ch, hidden_ch), jnp.float32, -lim2, lim2)
    b2 = jax.random.uniform(kb2, (output_ch,), jnp.float32, -lim2, lim2)

    # One-time layout prep (transpose + lane padding) — NOT done per call.
    params = prepare_params(w1, b1, w2, b2)

    # Exercise the Pallas path (forced) on every activation branch, including
    # the padded-softmax masking and the unpadded masked output store.
    for act in (None, "relu", "tanh", "sigmoid", "softmax"):
        out = jax.block_until_ready(fcn_2layer(x, params, activation=act,
                                               use_pallas=True))
        ref = _reference(x, w1, b1, w2, b2, activation=act)
        assert out.shape == (B, output_ch), (act, out.shape)
        assert jnp.allclose(out, ref, atol=1e-5, rtol=1e-5), f"mismatch ({act})"

    # Auto-dispatch path: tiny problem -> fused plain-XLA fallback.
    xs = x[:16]
    out_small = jax.block_until_ready(fcn_2layer(xs, params, activation="softmax"))
    ref_small = _reference(xs, w1, b1, w2, b2, activation="softmax")
    assert out_small.shape == (16, output_ch)
    assert jnp.allclose(out_small, ref_small, atol=1e-5, rtol=1e-5)

    print("KERNEL_OK")
</pallas_src>

<mosaic_0001>
module attributes {stable_mosaic.version = 11 : i64} {
  func.func @_fcn2_kernel(%arg0: i32, %arg1: memref<64x32xf32, #tpu.memory_space<vmem>>, %arg2: memref<32x128xf32, #tpu.memory_space<vmem>>, %arg3: memref<1x128xf32, #tpu.memory_space<vmem>>, %arg4: memref<128x128xf32, #tpu.memory_space<vmem>>, %arg5: memref<1x128xf32, #tpu.memory_space<vmem>>, %arg6: memref<64x16xf32, #tpu.memory_space<vmem>>) attributes {dimension_semantics = [#tpu.dimension_semantics<parallel>], iteration_bounds = array<i64: 4>, scalar_prefetch = 0 : i64, scratch_operands = 0 : i64, tpu.core_type = #tpu.core_type<tc>, window_params = [{transform_indices = @transform_0, window_bounds = array<i64: 64, 32>}, {pipeline_mode = #tpu.pipeline_mode<synchronous>, transform_indices = @transform_1, window_bounds = array<i64: 32, 128>}, {pipeline_mode = #tpu.pipeline_mode<synchronous>, transform_indices = @transform_2, window_bounds = array<i64: 1, 128>}, {pipeline_mode = #tpu.pipeline_mode<synchronous>, transform_indices = @transform_3, window_bounds = array<i64: 128, 128>}, {pipeline_mode = #tpu.pipeline_mode<synchronous>, transform_indices = @transform_4, window_bounds = array<i64: 1, 128>}, {transform_indices = @transform_5, window_bounds = array<i64: 64, 16>}]} {
    %c0 = arith.constant 0 : index
    %c0_0 = arith.constant 0 : index
    %0 = vector.load %arg1[%c0, %c0_0] : memref<64x32xf32, #tpu.memory_space<vmem>>, vector<64x32xf32>
    %c0_1 = arith.constant 0 : index
    %c0_2 = arith.constant 0 : index
    %1 = vector.load %arg2[%c0_1, %c0_2] : memref<32x128xf32, #tpu.memory_space<vmem>>, vector<32x128xf32>
    %cst = arith.constant dense<0.000000e+00> : vector<64x128xf32>
    %2 = tpu.matmul %0, %1, %cst {dimension_numbers = #tpu.dot_dimension_numbers<[1], [0], [0], [1], [0, 0, 1, 1], [], []>} : vector<64x32xf32>, vector<32x128xf32>, vector<64x128xf32> -> vector<64x128xf32>
    %c0_3 = arith.constant 0 : index
    %c0_4 = arith.constant 0 : index
    %3 = vector.load %arg3[%c0_3, %c0_4] : memref<1x128xf32, #tpu.memory_space<vmem>>, vector<1x128xf32>
    %4 = vector.broadcast %3 : vector<1x128xf32> to vector<64x128xf32>
    %5 = arith.addf %2, %4 : vector<64x128xf32>
    %cst_5 = arith.constant 0.000000e+00 : f32
    %6 = vector.broadcast %cst_5 : f32 to vector<64x128xf32>
    %7 = arith.maximumf %5, %6 : vector<64x128xf32>
    %c0_6 = arith.constant 0 : index
    %c0_7 = arith.constant 0 : index
    %8 = vector.load %arg4[%c0_6, %c0_7] : memref<128x128xf32, #tpu.memory_space<vmem>>, vector<128x128xf32>
    %cst_8 = arith.constant dense<0.000000e+00> : vector<64x128xf32>
    %9 = tpu.matmul %7, %8, %cst_8 {dimension_numbers = #tpu.dot_dimension_numbers<[1], [0], [0], [1], [0, 0, 1, 1], [], []>} : vector<64x128xf32>, vector<128x128xf32>, vector<64x128xf32> -> vector<64x128xf32>
    %c0_9 = arith.constant 0 : index
    %c0_10 = arith.constant 0 : index
    %10 = vector.load %arg5[%c0_9, %c0_10] : memref<1x128xf32, #tpu.memory_space<vmem>>, vector<1x128xf32>
    %11 = vector.broadcast %10 : vector<1x128xf32> to vector<64x128xf32>
    %12 = arith.addf %9, %11 : vector<64x128xf32>
    %13 = vector.extract_strided_slice %12 {offsets = [0, 0], sizes = [64, 16], strides = [1, 1]} : vector<64x128xf32> to vector<64x16xf32>
    %c0_11 = arith.constant 0 : index
    %c0_12 = arith.constant 0 : index
    %14 = vector.load %arg6[%c0_11, %c0_12] : memref<64x16xf32, #tpu.memory_space<vmem>>, vector<64x16xf32>
    tpu.vector_store %arg6[%c0_11, %c0_12], %13 {strides = array<i32>} : memref<64x16xf32, #tpu.memory_space<vmem>>, vector<64x16xf32>,
    return
  }
  func.func @transform_0(%arg0: i32) -> (i32, i32) {
    %c0_i32 = arith.constant 0 : i32
    %c0_i32_0 = arith.constant 0 : i32
    return %arg0, %c0_i32 : i32, i32
  }
  func.func @transform_1(%arg0: i32) -> (i32, i32) {
    %c0_i32 = arith.constant 0 : i32
    %c0_i32_0 = arith.constant 0 : i32
    %c0_i32_1 = arith.constant 0 : i32
    return %c0_i32, %c0_i32_0 : i32, i32
  }
  func.func @transform_2(%arg0: i32) -> (i32, i32) {
    %c0_i32 = arith.constant 0 : i32
    %c0_i32_0 = arith.constant 0 : i32
    %c0_i32_1 = arith.constant 0 : i32
    return %c0_i32, %c0_i32_0 : i32, i32
  }
  func.func @transform_3(%arg0: i32) -> (i32, i32) {
    %c0_i32 = arith.constant 0 : i32
    %c0_i32_0 = arith.constant 0 : i32
    %c0_i32_1 = arith.constant 0 : i32
    return %c0_i32, %c0_i32_0 : i32, i32
  }
  func.func @transform_4(%arg0: i32) -> (i32, i32) {
    %c0_i32 = arith.constant 0 : i32
    %c0_i32_0 = arith.constant 0 : i32
    %c0_i32_1 = arith.constant 0 : i32
    return %c0_i32, %c0_i32_0 : i32, i32
  }
  func.func @transform_5(%arg0: i32) -> (i32, i32) {
    %c0_i32 = arith.constant 0 : i32
    %c0_i32_0 = arith.constant 0 : i32
    return %arg0, %c0_i32 : i32, i32
  }
}

</mosaic_0001>

<bundles_post_ra>
// kernel: tpu_custom_call.1
= control target key start
LH: loop header
LB: loop body
LE: loop exit
PB: predicated region body
PF: predicated region fallthrough
CT: control target
= control target key end

     0   :  { %s547_s18 = smov 0   ;;  %s663_s0 = inlined_call_operand.vmem [shape: f32[256,32], index: 0, kind: input, shape index: {}]   ;;  %s664_s1 = inlined_call_operand.vmem [shape: f32[32,128], index: 1, kind: input, shape index: {}]   ;;  %s665_s2 = inlined_call_operand.vmem [shape: f32[1,128], index: 2, kind: input, shape index: {}]   ;;  %s666_s3 = inlined_call_operand.vmem [shape: f32[128,128], index: 3, kind: input, shape index: {}]   ;;  %s667_s4 = inlined_call_operand.vmem [shape: f32[1,128], index: 4, kind: input, shape index: {}]   ;;  %s668_s5 = inlined_call_operand.vmem [shape: f32[256,16], index: 5, kind: output, shape index: {}]  }
   0x1 LB: > { %s444_s19 = sadd.s32 4294967295, %s515_s18   ;;  %p448_p0 = scmp.ge.s32.totalorder %s515_s18, 1  ;;  %s515_s18 = sphi %s547_s18, %s15_s18  }
   0x2   : > { %p188_p1 = scmp.lt.s32.totalorder %s515_s18, 5 }
   0x4   : > { %p189_p2 = pnand %p448_p0, %p188_p1 }
   0x5   : > { %s449_s24 = sshll.u32 (!%p189_p2), %s444_s19, 3 }
   0x6   : > { %192 = sbr.rel (%p189_p2) target bundleno = 324 (0x144), region = 40  ;;  %p217_p3 = scmp.lt.s32.totalorder (!%p189_p2), %s449_s24, 31 }
   0xb   : > { %v239_v0 = vld [vmem:[%s664_s1 + $0x18] sm:$0xff]  ;;  %v238_v1 = vld [vmem:[%s664_s1 + $0x10] sm:$0xff]  ;;  %v237_v2 = vld [vmem:[%s664_s1 + $0x8] sm:$0xff]  ;;  %s670_s24 = smov (!%p217_p3, %s449_s24), 31  ;;  %vm244_vm0 = vcmask 261120   ;;  %vm379_vm1 = vcmask 130048  }
   0xc   : > { %281 = vmatpush.msra.mxu0 %v239_v0  ;;  %463 = vmatpush.msra.mxu3 %v239_v0  ;;  %v236_v3 = vld [vmem:[%s664_s1] sm:$0xff]  ;;  %s450_s29 = sshll.u32 %s670_s24, 3  ;;  %v333_v8 = vld [vmem:[%s666_s3 + $0x78] sm:$0xff]  ;;  %v332_v9 = vld [vmem:[%s666_s3 + $0x70] sm:$0xff] }
   0xd   : > { %s575_s7 = scalar_lea.vmem %s663_s0, %s450_s29  ;;  %338 = vmatpush.msra.mxu1 %v333_v8  ;;  %v331_v10 = vld [vmem:[%s666_s3 + $0x68] sm:$0xff]  ;;  %467 = vmatpush.msra.mxu2 %v333_v8  ;;  %v330_v11 = vld [vmem:[%s666_s3 + $0x60] sm:$0xff]  ;;  %v329_v13 = vld [vmem:[%s666_s3 + $0x58] sm:$0xff]  ;;  %s226_s26 = scalar_lea.vmem %s668_s5, %s450_s29 }
   0xe   : > { %282 = vmatpush.msra.mxu0 %v238_v1  ;;  %464 = vmatpush.msra.mxu3 %v238_v1  ;;  %v228_v4 = vld [vmem:[%s575_s7] sm:$0xff]  ;;  %v234_v5 = vld [vmem:[%s575_s7 + $0x30] sm:$0xff]  ;;  %v229_v6 = vld [vmem:[%s575_s7 + $0x8] sm:$0xff] }
   0xf   : > { %v235_v7 = vld [vmem:[%s575_s7 + $0x38] sm:$0xff]  ;;  %339 = vmatpush.msra.mxu1 %v332_v9  ;;  %469 = vmatpush.msra.mxu2 %v332_v9  ;;  %v230_v12 = vld [vmem:[%s575_s7 + $0x10] sm:$0xff]  ;;  %v327_v15 = vld [vmem:[%s666_s3 + $0x48] sm:$0xff] }
  0x10   : > { %283 = vmatpush.msra.mxu0 %v237_v2  ;;  %465 = vmatpush.msra.mxu3 %v237_v2  ;;  %v328_v14 = vld [vmem:[%s666_s3 + $0x50] sm:$0xff]  ;;  %v326_v16 = vld [vmem:[%s666_s3 + $0x40] sm:$0xff]  ;;  %v231_v17 = vld [vmem:[%s575_s7 + $0x18] sm:$0xff] }
  0x11   : > { %340 = vmatpush.msra.mxu1 %v331_v10  ;;  %471 = vmatpush.msra.mxu2 %v331_v10  ;;  %v325_v18 = vld [vmem:[%s666_s3 + $0x38] sm:$0xff]  ;;  %v324_v19 = vld [vmem:[%s666_s3 + $0x30] sm:$0xff]  ;;  %v323_v20 = vld [vmem:[%s666_s3 + $0x28] sm:$0xff] }
  0x12   : > { %284 = vmatpush.msra.mxu0 %v236_v3  ;;  %466 = vmatpush.msra.mxu3 %v236_v3  ;;  %v322_v21 = vld [vmem:[%s666_s3 + $0x20] sm:$0xff]  ;;  %v321_v23 = vld [vmem:[%s666_s3 + $0x18] sm:$0xff]  ;;  %v233_v24 = vld [vmem:[%s575_s7 + $0x28] sm:$0xff] }
  0x13   : > { %453 = vmatmul.msk.f32.vlgmr.msra.gmra.mxu0 %vm244_vm0, %v228_v4  ;;  %459 = vmatmul.msk.f32.vlgmr.msra.gmra.mxu3 %vm244_vm0, %v234_v5  ;;  %v232_v22 = vld [vmem:[%s575_s7 + $0x20] sm:$0xff]  ;;  %v320_v25 = vld [vmem:[%s666_s3 + $0x10] sm:$0xff]  ;;  %v319_v26 = vld [vmem:[%s666_s3 + $0x8] sm:$0xff] }
  0x14   : > { %468 = vmatpush.msrb.mxu3 %v333_v8  ;;  %341 = vmatpush.msra.mxu1 %v330_v11  ;;  %v318_v27 = vld [vmem:[%s666_s3] sm:$0xff] }
  0x15   : > { %473 = vmatpush.msra.mxu2 %v330_v11  ;;  %v507_v28 = vld [vmem:[%s665_s2] ss:$0 sm:$0xff] }
  0x16   : > { %470 = vmatpush.msrb.mxu3 %v332_v9  ;;  %342 = vmatpush.msra.mxu1 %v329_v13  ;;  %v508_v53 = vld [vmem:[%s667_s4] ss:$0 sm:$0xff] }
  0x17   : > { %475 = vmatpush.msra.mxu2 %v329_v13 }
  0x18   : > { %472 = vmatpush.msrb.mxu3 %v331_v10  ;;  %343 = vmatpush.msra.mxu1 %v328_v14 }
  0x19   : > { %477 = vmatpush.msra.mxu2 %v328_v14 }
  0x1a   : > { %474 = vmatpush.msrb.mxu3 %v330_v11  ;;  %344 = vmatpush.msra.mxu1 %v327_v15 }
  0x1b   : > { %454 = vmatmul.msk.f32.gmra.mxu0 %vm244_vm0, %v229_v6  ;;  %460 = vmatmul.msk.f32.gmra.mxu3 %vm244_vm0, %v235_v7 }
  0x1c   : > { %476 = vmatpush.msrb.mxu3 %v329_v13  ;;  %479 = vmatpush.msra.mxu2 %v327_v15 }
  0x1d   : > { %345 = vmatpush.msra.mxu1 %v326_v16 }
  0x1e   : > { %478 = vmatpush.msrb.mxu3 %v328_v14  ;;  %481 = vmatpush.msra.mxu2 %v326_v16 }
  0x1f   : > { %346 = vmatpush.msra.mxu1 %v325_v18 }
  0x20   : > { %480 = vmatpush.msrb.mxu3 %v327_v15  ;;  %483 = vmatpush.msra.mxu2 %v325_v18 }
  0x21   : > { %347 = vmatpush.msra.mxu1 %v324_v19 }
  0x22   : > { %482 = vmatpush.msrb.mxu3 %v326_v16  ;;  %485 = vmatpush.msra.mxu2 %v324_v19 }
  0x23   : > { %455 = vmatmul.msk.f32.gmra.mxu0 %vm244_vm0, %v230_v12  ;;  %348 = vmatpush.msra.mxu1 %v323_v20 }
  0x24   : > { %484 = vmatpush.msrb.mxu3 %v325_v18  ;;  %487 = vmatpush.msra.mxu2 %v323_v20 }
  0x25   : > { %349 = vmatpush.msra.mxu1 %v322_v21 }
  0x26   : > { %486 = vmatpush.msrb.mxu3 %v324_v19  ;;  %489 = vmatpush.msra.mxu2 %v322_v21 }
  0x27   : > { %350 = vmatpush.msra.mxu1 %v321_v23 }
  0x28   : > { %488 = vmatpush.msrb.mxu3 %v323_v20  ;;  %491 = vmatpush.msra.mxu2 %v321_v23 }
  0x29   : > { %351 = vmatpush.msra.mxu1 %v320_v25 }
  0x2a   : > { %490 = vmatpush.msrb.mxu3 %v322_v21  ;;  %493 = vmatpush.msra.mxu2 %v320_v25 }
  0x2b   : > { %456 = vmatmul.msk.f32.gmra.mxu0 %vm244_vm0, %v231_v17  ;;  %352 = vmatpush.msra.mxu1 %v319_v26 }
  0x2c   : > { %492 = vmatpush.msrb.mxu3 %v321_v23  ;;  %495 = vmatpush.msra.mxu2 %v319_v26 }
  0x2d   : > { %353 = vmatpush.msra.mxu1 %v318_v27 }
  0x2e   : > { %494 = vmatpush.msrb.mxu3 %v320_v25  ;;  %497 = vmatpush.msra.mxu2 %v318_v27 }
  0x30   : > { %496 = vmatpush.msrb.mxu3 %v319_v26 }
  0x32   : > { %498 = vmatpush.msrb.mxu3 %v318_v27 }
  0x33   : > { %457 = vmatmul.msk.f32.gmra.mxu0 %vm244_vm0, %v232_v22 }
  0x3b   : > { %458 = vmatmul.msk.f32.gmra.mxu0 %vm244_vm0, %v233_v24 }
  0x90   : > { %v286_v29 = vpop.f32.mrf.mxu0 }
  0x91   : > { %v287_v30 = vadd.f32 %v507_v28, %v286_v29 }
  0x93   : > { %v310_v31 = vmax.f32 %v287_v30, 0.0 }
  0x95   : > { %354 = vmatmul.f32.vlgmr.msra.gmra.mxu1 %v310_v31 }
  0x96   : > { %v304_v32 = vpop.f32.mrf.mxu3 }
  0x97   : > { %v305_v34 = vadd.f32 %v507_v28, %v304_v32 }
  0x98   : > { %v289_v33 = vpop.f32.mrf.mxu0 }
  0x99   : > { %v290_v35 = vadd.f32 %v507_v28, %v289_v33  ;;  %v316_v36 = vmax.f32 %v305_v34, 0.0 }
  0x9b   : > { %v311_v37 = vmax.f32 %v290_v35, 0.0  ;;  %372 = vmatmul.f32.vlgmr.msrb.gmra.mxu3 %v316_v36 }
  0x9d   : > { %357 = vmatmul.f32.gmra.mxu1 %v311_v37 }
  0x9e   : > { %v307_v38 = vpop.f32.mrf.mxu3 }
  0x9f   : > { %v308_v40 = vadd.f32 %v507_v28, %v307_v38 }
  0xa0   : > { %v292_v39 = vpop.f32.mrf.mxu0 }
  0xa1   : > { %v293_v41 = vadd.f32 %v507_v28, %v292_v39  ;;  %v317_v42 = vmax.f32 %v308_v40, 0.0 }
  0xa3   : > { %v312_v43 = vmax.f32 %v293_v41, 0.0  ;;  %375 = vmatmul.f32.gmra.mxu3 %v317_v42 }
  0xa5   : > { %360 = vmatmul.f32.gmra.mxu1 %v312_v43 }
  0xa8   : > { %v295_v44 = vpop.f32.mrf.mxu0 }
  0xa9   : > { %v296_v45 = vadd.f32 %v507_v28, %v295_v44 }
  0xab   : > { %v313_v46 = vmax.f32 %v296_v45, 0.0 }
  0xad   : > { %363 = vmatmul.f32.vlgmr.msra.gmra.mxu2 %v313_v46 }
  0xb0   : > { %v298_v47 = vpop.f32.mrf.mxu0 }
  0xb1   : > { %v299_v48 = vadd.f32 %v507_v28, %v298_v47 }
  0xb3   : > { %v314_v49 = vmax.f32 %v299_v48, 0.0 }
  0xb5   : > { %366 = vmatmul.f32.gmra.mxu2 %v314_v49 }
  0xb8   : > { %v301_v50 = vpop.f32.mrf.mxu0 }
  0xb9   : > { %v302_v51 = vadd.f32 %v507_v28, %v301_v50 }
  0xbb   : > { %v315_v52 = vmax.f32 %v302_v51, 0.0 }
  0xbd   : > { %369 = vmatmul.f32.gmra.mxu2 %v315_v52 }
 0x112   : > { %v355_v54 = vpop.f32.mrf.mxu1 }
 0x113   : > { %v356_v55 = vadd.f32 %v508_v53, %v355_v54 }
 0x115   : > { %380 = vst.msk [vmem:[%s226_s26] sm:$0xff] %vm379_vm1, %v356_v55 }
 0x11a   : > { %v358_v56 = vpop.f32.mrf.mxu1 }
 0x11b   : > { %v359_v57 = vadd.f32 %v508_v53, %v358_v56 }
 0x11d   : > { %381 = vst.msk [vmem:[%s226_s26 + $0x8] sm:$0xff] %vm379_vm1, %v359_v57 }
 0x11e   : > { %v373_v58 = vpop.f32.mrf.mxu3 }
 0x11f   : > { %v374_v59 = vadd.f32 %v508_v53, %v373_v58 }
 0x121   : > { %386 = vst.msk [vmem:[%s226_s26 + $0x30] sm:$0xff] %vm379_vm1, %v374_v59 }
 0x122   : > { %v361_v60 = vpop.f32.mrf.mxu1 }
 0x123   : > { %v362_v61 = vadd.f32 %v508_v53, %v361_v60 }
 0x125   : > { %382 = vst.msk [vmem:[%s226_s26 + $0x10] sm:$0xff] %vm379_vm1, %v362_v61 }
 0x126   : > { %v376_v62 = vpop.f32.mrf.mxu3 }
 0x127   : > { %v377_v63 = vadd.f32 %v508_v53, %v376_v62 }
 0x129   : > { %387 = vst.msk [vmem:[%s226_s26 + $0x38] sm:$0xff] %vm379_vm1, %v377_v63 }
 0x130   : > { %v364_v0 = vpop.f32.mrf.mxu2 }
 0x131   : > { %v365_v1 = vadd.f32 %v508_v53, %v364_v0 }
 0x133   : > { %383 = vst.msk [vmem:[%s226_s26 + $0x18] sm:$0xff] %vm379_vm1, %v365_v1 }
 0x138   : > { %v367_v2 = vpop.f32.mrf.mxu2 }
 0x139   : > { %v368_v3 = vadd.f32 %v508_v53, %v367_v2 }
 0x13b   : > { %384 = vst.msk [vmem:[%s226_s26 + $0x20] sm:$0xff] %vm379_vm1, %v368_v3 }
 0x140   : > { %v370_v4 = vpop.f32.mrf.mxu2 }
 0x141   : > { %v371_v5 = vadd.f32 %v508_v53, %v370_v4 }
 0x143   : > { %385 = vst.msk [vmem:[%s226_s26 + $0x28] sm:$0xff] %vm379_vm1, %v371_v5 }
 0x144 PF: > { %s15_s18 = sadd.s32 1, %s515_s18  }
 0x145   : > { %p12_p4 = scmp.ge.s32.totalorder %s15_s18, 6  }
 0x147   :  { %14 = sbr.rel (!%p12_p4) target bundleno = 1 (0x1), region = 70 }

</bundles_post_ra>
